<compile_context>
chip_gen: v7x
topology: tpu7x:2x2x1
jax: 0.10.0
libtpu: 0.0.40
codegen_flags: <defaults>
</compile_context>

<pallas_src>
import functools

import jax
import jax.numpy as jnp
from jax.experimental import pallas as pl
from jax.experimental.pallas import tpu as pltpu

EPS = 1e-5
_LANE = 128
_ROW_TARGET = 2048            # bucket-pass rows per block  (~1 MiB f32 block)
_R_TARGET = 1024              # stats/final rows per block  (in ~0.5 MiB, out ~2 MiB)
_VMEM_LIMIT = 48 * 1024 * 1024  # explicit scoped-VMEM cap; safe under v7x's 64 MiB


def _pick_tile(n, target, mult=8):
    """Largest divisor of n <= target, preferring multiples of `mult`.
    Full-dim blocks are always legal, so fall back to n when n <= target."""
    cap = min(n, target)
    d = cap - (cap % mult)
    while d >= mult:
        if n % d == 0:
            return d
        d -= mult
    if n <= target:
        return n
    for d in range(cap, 0, -1):
        if n % d == 0:
            return d
    return n


def _elu(z):
    # F.elu with alpha=1:  z if z > 0 else exp(z) - 1
    return jnp.where(z > 0, z, jnp.exp(jnp.minimum(z, 0.0)) - 1.0)


def _split_branches(x, a0, a1, a2):
    x1 = _elu(x - a2)
    x2 = _elu((a2 - a1) - _elu(a2 - x))
    x3 = _elu((a1 - a0) - _elu(a1 - x))
    x4 = -_elu(a0 - x)
    return x1, x2, x3, x4


# --------------------------------------------------------------------------- #
# Pass A/B: global bucket sums (mean_split reductions)
# --------------------------------------------------------------------------- #
def _bucket_sums_kernel(centers_ref, x_ref, acc_ref):
    t = pl.program_id(0)

    @pl.when(t == 0)
    def _init():
        acc_ref[...] = jnp.zeros_like(acc_ref)

    x = x_ref[...].astype(jnp.float32)              # (row_t, LANE)
    c1 = centers_ref[1]
    c2 = centers_ref[2]
    c3 = centers_ref[3]
    # Hoisted masks.  centers[0] == min(x), so (x < centers[0]) is identically
    # False and bucket0 == (x < c1) directly (torch.diff on bool == XOR).
    lt1 = x < c1
    lt2 = x < c2
    lt3 = x < c3
    m0 = lt1
    m1 = jnp.logical_xor(lt2, lt1)
    m2 = jnp.logical_xor(lt3, lt2)

    zero = jnp.zeros_like(x)
    s0 = jnp.sum(jnp.where(m0, x, zero), axis=0, keepdims=True)   # (1, LANE)
    s1 = jnp.sum(jnp.where(m1, x, zero), axis=0, keepdims=True)
    s2 = jnp.sum(jnp.where(m2, x, zero), axis=0, keepdims=True)
    acc_ref[...] += jnp.concatenate([s0, s1, s2], axis=0)          # (3, LANE)


# --------------------------------------------------------------------------- #
# Pass C: per-channel BatchNorm statistics (single sweep: sum & sum of squares)
# --------------------------------------------------------------------------- #
def _bn_stats_kernel(avg_ref, x_ref, stat_ref):
    g = pl.program_id(1)

    @pl.when(g == 0)
    def _init():
        stat_ref[...] = jnp.zeros_like(stat_ref)

    x = x_ref[...].astype(jnp.float32)              # (r_t, LANE)  (one channel)
    a0 = avg_ref[0]
    a1 = avg_ref[1]
    a2 = avg_ref[2]
    branches = _split_branches(x, a0, a1, a2)

    parts = [jnp.sum(b, axis=0, keepdims=True) for b in branches]          # sums
    parts += [jnp.sum(b * b, axis=0, keepdims=True) for b in branches]     # sumsq
    stat_ref[...] += jnp.concatenate(parts, axis=0)                        # (8, LANE)


# --------------------------------------------------------------------------- #
# Pass D: recompute branches, apply norm_momentum*x + norm_scale*BN(x), write out
# --------------------------------------------------------------------------- #
def _final_kernel(avg_ref, mean_ref, inv_ref, mom_ref, x_ref, o_ref, *, norm_scale):
    c = pl.program_id(0)
    x = x_ref[...].astype(jnp.float32)              # (r_t, LANE)  (one channel)
    a0 = avg_ref[0]
    a1 = avg_ref[1]
    a2 = avg_ref[2]
    branches = _split_branches(x, a0, a1, a2)

    for k, xk in enumerate(branches):
        y = mom_ref[k] * xk + norm_scale * (xk - mean_ref[k, c]) * inv_ref[k, c]
        o_ref[k] = y.astype(o_ref.dtype)


# --------------------------------------------------------------------------- #
# Wrapper
# --------------------------------------------------------------------------- #
def relu_split_norm(x_nchw, norm_momenta, norm_scale):
    """x_nchw: (N, C, H, W) float32.  Returns (4, N, C, H, W)."""
    N, C, H, W = x_nchw.shape
    HW = H * W
    dt = x_nchw.dtype
    total = float(N * C * HW)
    n_elem = N * C * HW

    # centers = quantile(x.flatten(), linspace(0,1,4))
    # TODO(synk): global sort stays outside the kernel (see header note).
    qs = jnp.linspace(0.0, 1.0, 4, dtype=jnp.float32)
    centers = jnp.quantile(x_nchw.reshape(-1).astype(jnp.float32), qs)

    # Lane-dense, transpose-free views (pure reshapes, no HBM permutes).
    lane = _LANE if HW % _LANE == 0 else HW
    R = HW // lane
    x4 = x_nchw.reshape(N, C, R, lane)
    rows = N * C * R
    x2 = x_nchw.reshape(rows, lane)

    row_t = _pick_tile(rows, _ROW_TARGET)
    r_t = _pick_tile(R, _R_TARGET)
    r_blocks = R // r_t
    G = N * r_blocks
    T = rows // row_t

    cparams_red = pltpu.CompilerParams(
        dimension_semantics=("arbitrary",), vmem_limit_bytes=_VMEM_LIMIT)
    cparams_acc = pltpu.CompilerParams(
        dimension_semantics=("parallel", "arbitrary"), vmem_limit_bytes=_VMEM_LIMIT)

    # ---- passes A & B: bucket means -> mean_split (max_iter=1, 'any' mode) ----
    def bucket_means(ctrs):
        acc = pl.pallas_call(
            _bucket_sums_kernel,
            out_shape=jax.ShapeDtypeStruct((3, lane), jnp.float32),
            grid=(T,),
            in_specs=[pl.BlockSpec(memory_space=pltpu.MemorySpace.SMEM),       # centers
                      pl.BlockSpec((row_t, lane), lambda t: (t, 0))],          # x tiles
            out_specs=pl.BlockSpec((3, lane), lambda t: (0, 0)),               # resident acc
            compiler_params=cparams_red,
            cost_estimate=pl.CostEstimate(flops=10 * n_elem, transcendentals=0,
                                          bytes_accessed=n_elem * 4),
        )(ctrs, x2)
        return jnp.sum(acc, axis=1) / total         # (3,) bucket means over ALL elems

    avg = bucket_means(centers)
    centers2 = jnp.stack([centers[0],
                          (avg[0] + avg[1]) * 0.5,
                          (avg[1] + avg[2]) * 0.5,
                          centers[3]])
    avg = bucket_means(centers2)                    # final avg0, avg1, avg2

    # ---- pass C: per-channel sum & sum-of-squares of the 4 branches ----------
    stats = pl.pallas_call(
        _bn_stats_kernel,
        out_shape=jax.ShapeDtypeStruct((C, 8, lane), jnp.float32),
        grid=(C, G),
        in_specs=[pl.BlockSpec(memory_space=pltpu.MemorySpace.SMEM),           # avg (3,)
                  pl.BlockSpec((None, None, r_t, lane),
                               lambda c, g: (g // r_blocks, c, g % r_blocks, 0))],
        out_specs=pl.BlockSpec((None, 8, lane), lambda c, g: (c, 0, 0)),       # per-chan acc
        compiler_params=cparams_acc,
        cost_estimate=pl.CostEstimate(flops=40 * n_elem, transcendentals=6 * n_elem,
                                      bytes_accessed=n_elem * 4),
    )(avg, x4)

    count = float(N * HW)                            # per-channel element count
    ch_sum = jnp.transpose(jnp.sum(stats[:, 0:4, :], axis=2))      # (4, C)
    ch_sumsq = jnp.transpose(jnp.sum(stats[:, 4:8, :], axis=2))    # (4, C)
    mean = ch_sum / count
    var = jnp.maximum(ch_sumsq / count - mean * mean, 0.0)         # biased (training) var
    inv_std = 1.0 / jnp.sqrt(var + EPS)

    # ---- pass D: recompute branches, BN-mix, write (4, N, C, R, LANE) --------
    out5 = pl.pallas_call(
        functools.partial(_final_kernel, norm_scale=float(norm_scale)),
        out_shape=jax.ShapeDtypeStruct((4, N, C, R, lane), dt),
        grid=(C, G),
        in_specs=[pl.BlockSpec(memory_space=pltpu.MemorySpace.SMEM),           # avg (3,)
                  pl.BlockSpec(memory_space=pltpu.MemorySpace.SMEM),           # mean (4,C)
                  pl.BlockSpec(memory_space=pltpu.MemorySpace.SMEM),           # inv_std (4,C)
                  pl.BlockSpec(memory_space=pltpu.MemorySpace.SMEM),           # momenta (4,)
                  pl.BlockSpec((None, None, r_t, lane),
                               lambda c, g: (g // r_blocks, c, g % r_blocks, 0))],
        out_specs=pl.BlockSpec((4, None, None, r_t, lane),
                               lambda c, g: (0, g // r_blocks, c, g % r_blocks, 0)),
        compiler_params=cparams_acc,
        cost_estimate=pl.CostEstimate(flops=60 * n_elem, transcendentals=6 * n_elem,
                                      bytes_accessed=5 * n_elem * 4),
    )(avg, mean, inv_std, norm_momenta.astype(jnp.float32), x4)

    return out5.reshape(4, N, C, H, W)


# --------------------------------------------------------------------------- #
# Pure-JAX reference replicating the PyTorch forward (training-mode BN)
# --------------------------------------------------------------------------- #
def _reference(x_nchw, norm_momenta, norm_scale):
    dt = x_nchw.dtype
    x_flat = x_nchw.reshape(-1)
    total = x_flat.size
    centers = jnp.quantile(x_flat, jnp.linspace(0.0, 1.0, 4, dtype=dt)).astype(dt)

    def bucket_avgs(c):
        lt = x_flat[:, None] < c[None, :]                            # (total, 4)
        ind = jnp.logical_xor(lt[:, 1:], lt[:, :-1]).astype(dt)      # (total, 3)
        return jnp.sum(ind * x_flat[:, None], axis=0) / total

    avg = bucket_avgs(centers)
    centers = centers.at[1:-1].set((avg[:-1] + avg[1:]) / 2.0)
    avg0, avg1, avg2 = bucket_avgs(centers)

    x1 = _elu(x_nchw - avg2)
    x2 = _elu(avg2 - avg1 - _elu(avg2 - x_nchw))
    x3 = _elu(avg1 - avg0 - _elu(avg1 - x_nchw))
    x4 = -_elu(avg0 - x_nchw)

    def bn_mix(xk, mom):
        mean = jnp.mean(xk, axis=(0, 2, 3), keepdims=True)
        var = jnp.mean((xk - mean) ** 2, axis=(0, 2, 3), keepdims=True)
        return mom * xk + norm_scale * (xk - mean) / jnp.sqrt(var + EPS)

    return jnp.stack([bn_mix(x1, norm_momenta[0]),
                      bn_mix(x2, norm_momenta[1]),
                      bn_mix(x3, norm_momenta[2]),
                      bn_mix(x4, norm_momenta[3])])


if __name__ == "__main__":
    key = jax.random.PRNGKey(0)
    N, C, H, W = 2, 4, 16, 16
    x = jax.random.normal(key, (N, C, H, W), dtype=jnp.float32)

    # Deterministic parameter init matching nn.Module.__init__:
    # norm_momentum1..4 = 0.0 ; norm_scale chosen as 0.5 (constructor arg).
    norm_momenta = jnp.zeros((4,), dtype=jnp.float32)
    norm_scale = 0.5

    out = jax.block_until_ready(relu_split_norm(x, norm_momenta, norm_scale))
    ref = _reference(x, norm_momenta, norm_scale)

    assert out.shape == (4, N, C, H, W), out.shape
    max_err = float(jnp.max(jnp.abs(out - ref)))
    assert jnp.allclose(out, ref, atol=1e-4, rtol=1e-4), max_err

    print("KERNEL_OK")
</pallas_src>

<mosaic_0001>
module attributes {stable_mosaic.version = 11 : i64} {
  func.func @_bucket_sums_kernel(%arg0: i32, %arg1: memref<4xf32, #tpu.memory_space<smem>>, %arg2: memref<16x128xf32, #tpu.memory_space<vmem>>, %arg3: memref<3x128xf32, #tpu.memory_space<vmem>>) attributes {dimension_semantics = [#tpu.dimension_semantics<arbitrary>], iteration_bounds = array<i64: 1>, scalar_prefetch = 0 : i64, scratch_operands = 0 : i64, tpu.core_type = #tpu.core_type<tc>, window_params = [{transform_indices = @transform_0, window_bounds = array<i64: 4>}, {transform_indices = @transform_1, window_bounds = array<i64: 16, 128>}, {pipeline_mode = #tpu.pipeline_mode<synchronous>, transform_indices = @transform_2, window_bounds = array<i64: 3, 128>}]} {
    %c0_i32 = arith.constant 0 : i32
    %0 = arith.cmpi eq, %arg0, %c0_i32 : i32
    %1 = arith.extui %0 : i1 to i32
    %c0_i32_0 = arith.constant 0 : i32
    %2 = arith.cmpi ne, %1, %c0_i32_0 : i32
    scf.if %2 {
      %cst_9 = arith.constant 0.000000e+00 : f32
      %29 = vector.broadcast %cst_9 : f32 to vector<3x128xf32>
      %c0_10 = arith.constant 0 : index
      %c0_11 = arith.constant 0 : index
      %30 = vector.load %arg3[%c0_10, %c0_11] : memref<3x128xf32, #tpu.memory_space<vmem>>, vector<3x128xf32>
      tpu.vector_store %arg3[%c0_10, %c0_11], %29 {strides = array<i32>} : memref<3x128xf32, #tpu.memory_space<vmem>>, vector<3x128xf32>,
    } else {
    }
    %c0 = arith.constant 0 : index
    %c0_1 = arith.constant 0 : index
    %3 = vector.load %arg2[%c0, %c0_1] : memref<16x128xf32, #tpu.memory_space<vmem>>, vector<16x128xf32>
    %c1 = arith.constant 1 : index
    %4 = memref.load %arg1[%c1] : memref<4xf32, #tpu.memory_space<smem>>
    %c2 = arith.constant 2 : index
    %5 = memref.load %arg1[%c2] : memref<4xf32, #tpu.memory_space<smem>>
    %c3 = arith.constant 3 : index
    %6 = memref.load %arg1[%c3] : memref<4xf32, #tpu.memory_space<smem>>
    %7 = vector.broadcast %4 : f32 to vector<16x128xf32>
    %8 = arith.cmpf olt, %3, %7 : vector<16x128xf32>
    %9 = vector.broadcast %5 : f32 to vector<16x128xf32>
    %10 = arith.cmpf olt, %3, %9 : vector<16x128xf32>
    %11 = vector.broadcast %6 : f32 to vector<16x128xf32>
    %12 = arith.cmpf olt, %3, %11 : vector<16x128xf32>
    %13 = arith.xori %10, %8 : vector<16x128xi1>
    %14 = arith.xori %12, %10 : vector<16x128xi1>
    %cst = arith.constant 0.000000e+00 : f32
    %15 = vector.broadcast %cst : f32 to vector<16x128xf32>
    %16 = arith.select %8, %3, %15 : vector<16x128xi1>, vector<16x128xf32>
    %cst_2 = arith.constant dense<0.000000e+00> : vector<128xf32>
    %17 = vector.multi_reduction <add>, %16, %cst_2 [0] : vector<16x128xf32> to vector<128xf32>
    %18 = vector.shape_cast %17 : vector<128xf32> to vector<1x128xf32>
    %19 = arith.select %13, %3, %15 : vector<16x128xi1>, vector<16x128xf32>
    %cst_3 = arith.constant dense<0.000000e+00> : vector<128xf32>
    %20 = vector.multi_reduction <add>, %19, %cst_3 [0] : vector<16x128xf32> to vector<128xf32>
    %21 = vector.shape_cast %20 : vector<128xf32> to vector<1x128xf32>
    %22 = arith.select %14, %3, %15 : vector<16x128xi1>, vector<16x128xf32>
    %cst_4 = arith.constant dense<0.000000e+00> : vector<128xf32>
    %23 = vector.multi_reduction <add>, %22, %cst_4 [0] : vector<16x128xf32> to vector<128xf32>
    %24 = vector.shape_cast %23 : vector<128xf32> to vector<1x128xf32>
    %c0_5 = arith.constant 0 : index
    %c0_6 = arith.constant 0 : index
    %25 = vector.load %arg3[%c0_5, %c0_6] : memref<3x128xf32, #tpu.memory_space<vmem>>, vector<3x128xf32>
    %26 = tpu.concatenate %18, %21, %24 in 0 : vector<1x128xf32>, vector<1x128xf32>, vector<1x128xf32> -> vector<3x128xf32>
    %27 = arith.addf %25, %26 : vector<3x128xf32>
    %c0_7 = arith.constant 0 : index
    %c0_8 = arith.constant 0 : index
    %28 = vector.load %arg3[%c0_7, %c0_8] : memref<3x128xf32, #tpu.memory_space<vmem>>, vector<3x128xf32>
    tpu.vector_store %arg3[%c0_7, %c0_8], %27 {strides = array<i32>} : memref<3x128xf32, #tpu.memory_space<vmem>>, vector<3x128xf32>,
    return
  }
  func.func @transform_0(%arg0: i32) -> i32 {
    %c0_i32 = arith.constant 0 : i32
    %c0_i32_0 = arith.constant 0 : i32
    return %c0_i32 : i32
  }
  func.func @transform_1(%arg0: i32) -> (i32, i32) {
    %c0_i32 = arith.constant 0 : i32
    %c0_i32_0 = arith.constant 0 : i32
    return %arg0, %c0_i32 : i32, i32
  }
  func.func @transform_2(%arg0: i32) -> (i32, i32) {
    %c0_i32 = arith.constant 0 : i32
    %c0_i32_0 = arith.constant 0 : i32
    %c0_i32_1 = arith.constant 0 : i32
    return %c0_i32, %c0_i32_0 : i32, i32
  }
}

</mosaic_0001>

<bundles_post_ra>
// kernel: tpu_custom_call.1
= control target key start
LH: loop header
LB: loop body
LE: loop exit
PB: predicated region body
PF: predicated region fallthrough
CT: control target
= control target key end

     0   :  { %7 = vsyncpa [#allocation5], 0  ;;  %s252_s0 = inlined_call_operand.hbm [shape: f32[4], index: 0, kind: input, shape index: {}]   ;;  %s253_s1 = inlined_call_operand.hbm [shape: f32[16,128], index: 1, kind: input, shape index: {}]   ;;  %s254_s2 = inlined_call_operand.hbm [shape: f32[3,128], index: 2, kind: output, shape index: {}]  }
   0x1   :  { %8 = vsyncpa [#allocation3], 0 }
   0x2   :  { %9 = vsyncpa [#allocation4], 0  ;;  %s119_s11 = scalar_lea.hbm %s252_s0, 16 }
   0x3   :  { %p120_p0 = scmp.ne.s32.totalorder %s252_s0, %s119_s11  ;;  %p123_p1 = scmp.lt.u32.totalorder %s119_s11, %s252_s0 }
   0x5   :  { %p125_p2 = pnand %p123_p1, %p120_p0 }
   0x7   :  { %128 = shalt.err (!%p125_p2)
}
   0x8   :  { %s179_s16 = smov [#allocation2]   ;;  %s180_s19 = smov [#allocation6]  }
   0x9   :  { %17 = dma.hbm_to_smem %s252_s0, 16, %s179_s16, [#allocation5]  }
   0xa   :  { %s23_s20 = sshll.u32 %s180_s19, 4  ;;  %s129_s23 = scalar_lea.hbm %s253_s1, 256  ;;  %s24_s20 = int_to_ptr.vmem [resolvable:$true] %s23_s20 }
   0xb   :  { %p130_p3 = scmp.ne.s32.totalorder %s253_s1, %s129_s23  ;;  %p133_p4 = scmp.lt.u32.totalorder %s129_s23, %s253_s1 }
   0xd   :  { %p135_p5 = pnand %p133_p4, %p130_p3 }
   0xf   :  { %138 = shalt.err (!%p135_p5)
}
  0x10   :  { %s139_s28 = scalar_lea.vmem %s24_s20, 256  ;;  %p144_p7 = scmp.lt.s32.totalorder %s24_s20, %s24_s20 }
  0x11   :  { %p140_p6 = scmp.ne.s32.totalorder %s24_s20, %s139_s28  ;;  %p145_p8 = scmp.lt.s32.totalorder %s139_s28, %s139_s28 }
  0x13   :  { %p146_p9 = por %p145_p8, %p144_p7 }
  0x15   :  { %p147_p10 = pnand %p146_p9, %p140_p6 }
  0x17   :  { %150 = shalt.err (!%p147_p10)
}
  0x18   :  { %s181_s0 = smov 128   ;;  %s182_s29 = smov 8  }
  0x19   :  { %29 = dma.hbm_to_vmem [thread:$0]  %s253_s1, 256, %s24_s20, [#allocation3], %s181_s0, %s181_s0, %s182_s29  }
  0x1a   :  { %173 = dma.done.wait [#allocation5], 16  }
  0x1b   :  { %174 = vsyncadd [#allocation5], 4294967280 }
  0x1c   :  { %175 = dma.done.wait [#allocation3], 256  }
  0x1d   :  { %176 = vsyncadd [#allocation3], 4294967040 }
  0x1e   :  { %36 = sfence }
  0x1f   :  { %s110_s4 = sld [smem:[#allocation2 + $0x1]]  ;;  %v183_v0 = vmov 0.0   ;;  %s111_s5 = sld [smem:[#allocation2 + $0x2]]  ;;  %v42_v1 = vld [vmem:[#allocation6] sm:$0xff]  ;;  %v43_v2 = vld [vmem:[#allocation6 + $0x8] sm:$0xff]  ;;  %vm88_vm10 = vcmask 1040384  }
  0x20   :  { %41 = vst [vmem:[#allocation7] sm:$0x7] %v183_v0  ;;  %s112_s6 = sld [smem:[#allocation2 + $0x3]]  ;;  %vm90_vm11 = vcmask 1041408   ;;  %s184_s1 = smov [#allocation7]  }
  0x21   :  { %s100_s7 = sshll.u32 %s184_s1, 4  ;;  %s101_s7 = int_to_ptr.vmem [resolvable:$true] %s100_s7 }
  0x22   :  { %s151_s8 = scalar_lea.vmem %s101_s7, 64  ;;  %p156_p12 = scmp.lt.s32.totalorder %s101_s7, %s101_s7 }
  0x23   :  { %p152_p11 = scmp.ne.s32.totalorder %s101_s7, %s151_s8  ;;  %p157_p13 = scmp.lt.s32.totalorder %s151_s8, %s151_s8 }
  0x25   :  { %v47_v3 = vstv %s110_s4  ;;  %v50_v4 = vstv %s111_s5  ;;  %p158_p0 = por %p157_p13, %p156_p12 }
  0x26   :  { %vm48_vm0 = vcmp.lt.f32.partialorder %v42_v1, %v47_v3  ;;  %vm49_vm1 = vcmp.lt.f32.partialorder %v43_v2, %v47_v3  ;;  %v53_v5 = vstv %s112_s6  ;;  %vm224_vm2 = vcmp.lt.f32.partialorder %v42_v1, %v50_v4 }
  0x27   :  { %vm228_vm3 = vcmp.lt.f32.partialorder %v43_v2, %v50_v4  ;;  %vm54_vm4 = vcmp.lt.f32.partialorder %v42_v1, %v53_v5  ;;  %vm55_vm5 = vcmp.lt.f32.partialorder %v43_v2, %v53_v5  ;;  %vm56_vm6 = vmxor %vm224_vm2, %vm48_vm0  ;;  %v60_v8 = vsel %vm48_vm0, %v42_v1, 0.0  ;;  %v87_v35 = vld [vmem:[#allocation7] sm:$0x7]  ;;  %p159_p1 = pnand %p158_p0, %p152_p11 }
  0x28   :  { %v61_v9 = vsel %vm49_vm1, %v43_v2, 0.0  ;;  %vm57_vm7 = vmxor %vm228_vm3, %vm49_vm1  ;;  %v69_v11 = vsel %vm56_vm6, %v42_v1, 0.0 }
  0x29   :  { %v62_v10 = vadd.f32 %v61_v9, %v60_v8  ;;  %vm58_vm8 = vmxor %vm54_vm4, %vm224_vm2  ;;  %v70_v12 = vsel %vm57_vm7, %v43_v2, 0.0 }
  0x2a   :  { %vm59_vm9 = vmxor %vm55_vm5, %vm228_vm3  ;;  %v71_v14 = vadd.f32 %v70_v12, %v69_v11  ;;  %v78_v15 = vsel %vm58_vm8, %v42_v1, 0.0 }
  0x2b   :  { %v63_v13 = vrot.slane %v62_v10, 4  ;;  %v79_v16 = vsel %vm59_vm9, %v43_v2, 0.0 }
  0x2c   :  { %v72_v18 = vrot.slane %v71_v14, 4  ;;  %v80_v19 = vadd.f32 %v79_v16, %v78_v15 }
  0x2d   :  { %v64_v17 = vadd.f32 %v63_v13, %v62_v10 }
  0x2e   :  { %v73_v21 = vadd.f32 %v72_v18, %v71_v14  ;;  %v81_v22 = vrot.slane %v80_v19, 4 }
  0x2f   :  { %v65_v20 = vrot.slane %v64_v17, 2 }
  0x30   :  { %v74_v24 = vrot.slane %v73_v21, 2  ;;  %v82_v25 = vadd.f32 %v81_v22, %v80_v19 }
  0x31   :  { %v66_v23 = vadd.f32 %v65_v20, %v64_v17 }
  0x32   :  { %v75_v27 = vadd.f32 %v74_v24, %v73_v21  ;;  %v83_v28 = vrot.slane %v82_v25, 2 }
  0x33   :  { %v67_v26 = vrot.slane %v66_v23, 1 }
  0x34   :  { %v76_v30 = vrot.slane %v75_v27, 1  ;;  %v84_v31 = vadd.f32 %v83_v28, %v82_v25 }
  0x35   :  { %v68_v29 = vadd.f32 %v67_v26, %v66_v23 }
  0x36   :  { %v77_v32 = vadd.f32 %v76_v30, %v75_v27  ;;  %v85_v33 = vrot.slane %v84_v31, 1 }
  0x38   :  { %v86_v34 = vadd.f32 %v85_v33, %v84_v31  ;;  %v89_v36 = vsel %vm88_vm10, %v68_v29, %v77_v32 }
  0x3a   :  { %v91_v37 = vsel %vm90_vm11, %v89_v36, %v86_v34 }
  0x3b   :  { %v92_v38 = vadd.f32 %v91_v37, %v87_v35 }
  0x3d   :  { %93 = vst [vmem:[#allocation7] sm:$0x7] %v92_v38 }
  0x3e   :  { %162 = shalt.err (!%p159_p1)
}
  0x3f   :  { %s163_s11 = scalar_lea.hbm %s254_s2, 64 }
  0x40   :  { %p164_p2 = scmp.ne.s32.totalorder %s254_s2, %s163_s11  ;;  %p167_p3 = scmp.lt.u32.totalorder %s163_s11, %s254_s2 }
  0x42   :  { %p169_p4 = pnand %p167_p3, %p164_p2 }
  0x44   :  { %172 = shalt.err (!%p169_p4)
}
  0x45   :  { %103 = dma.vmem_to_hbm [thread:$0]  %s101_s7, 64, %s254_s2, [#allocation4]  }
  0x46   :  { %177 = dma.done.wait [#allocation4], 64  }
  0x47   :  { %178 = vsyncadd [#allocation4], 4294967232 }
  0x48   :  { %107 = vsyncpa [#allocation3], 1 }
  0x49   :  { %108 = vsyncpa [#allocation4], 1 }
  0x4a   :  { %109 = vsyncpa [#allocation5], 1 }

</bundles_post_ra>
